<compile_context>
chip_gen: v7x
topology: tpu7x:2x2x1
jax: 0.10.0
libtpu: 0.0.40
codegen_flags: <defaults>
</compile_context>

<pallas_src>
import jax
import jax.numpy as jnp
from jax.experimental import pallas as pl
from jax.experimental.pallas import tpu as pltpu


# ---------------------------------------------------------------------------
# Kernel
# ---------------------------------------------------------------------------
def _cross_attn_pool_kernel(x_ref, cq_ref, mask_ref, weff_ref, o_ref):
    # x_ref:    (TB, S, E) f32   raw inputs (streamed once per block)
    # cq_ref:   (TB, C)    f32   cross query, q-dim squeezed (TB on sublanes)
    # mask_ref: (TB, S)    f32   1.0 => masked / padded position
    # weff_ref: (C, E)     f32   fused weight  Wq^T @ Wk
    # o_ref:    (TB, E)    f32
    x = x_ref[...]
    cq = cq_ref[...]
    m = mask_ref[...]

    # Fused query projection as ONE 2-D MXU matmul: q_eff = cq @ (Wq^T Wk) -> (TB, E)
    q_eff = jnp.dot(cq, weff_ref[...], preferred_element_type=jnp.float32)

    # scores[b, s] = <q_eff[b, :], x[b, s, :]>   -- VPU mul + lane reduce (no M=1 MXU)
    scores = jnp.sum(q_eff[:, None, :] * x, axis=-1)            # (TB, S)

    masked = m > 0.5
    scores = jnp.where(masked, -jnp.inf, scores)
    # fully-masked rows -> uniform softmax (matches masked_fill(all(mask), 1.0))
    all_masked = jnp.min(m, axis=-1, keepdims=True) > 0.5       # (TB, 1)
    scores = jnp.where(all_masked, 1.0, scores)

    # softmax over the sequence axis (lanes)
    smax = jnp.max(scores, axis=-1, keepdims=True)
    e = jnp.exp(scores - smax)
    denom = jnp.sum(e, axis=-1, keepdims=True)
    r = pl.reciprocal(denom, approx=True)          # EUP slot (otherwise idle)
    r = r * (2.0 - denom * r)                      # one Newton step -> ~f32 accuracy
    attn = e * r                                   # (TB, S)

    # Weighted pooling over the RAW inputs: out[b, :] = sum_s attn[b, s] * x[b, s, :]
    # VPU mul + sublane reduce.
    o_ref[...] = jnp.sum(attn[:, :, None] * x, axis=1)          # (TB, E)


# ---------------------------------------------------------------------------
# Wrapper helpers
# ---------------------------------------------------------------------------
def _round_up(v, m):
    return (v + m - 1) // m * m


def _tpu_vmem_and_cores():
    """Best-effort generation query: (physical VMEM bytes, TensorCores per chip)."""
    vmem_cap = 64 << 20          # conservative default (v7x per-TC physical VMEM)
    cores = 1
    try:
        info = pltpu.get_tpu_info()
        vmem_cap = int(getattr(info, "vmem_capacity_bytes", vmem_cap) or vmem_cap)
        for name in ("num_cores", "tensorcores_per_chip", "cores_per_chip",
                     "num_tensorcores"):
            v = getattr(info, name, None)
            if v:
                cores = int(v)
                break
    except Exception:
        pass
    return vmem_cap, max(1, cores)


def _block_vmem_bytes(tb, S, E, C, itemsize=4):
    """(8,128)-padded VMEM footprint of all double-buffered blocks for one grid step."""
    x_blk = tb * _round_up(S, 8) * _round_up(E, 128) * itemsize
    cq_blk = _round_up(tb, 8) * _round_up(C, 128) * itemsize
    m_blk = _round_up(tb, 8) * _round_up(S, 128) * itemsize
    o_blk = _round_up(tb, 8) * _round_up(E, 128) * itemsize
    w_blk = _round_up(C, 8) * _round_up(E, 128) * itemsize      # grid-invariant, tiny
    return 2 * (x_blk + cq_blk + m_blk + o_blk + w_blk)


def _choose_block_b(B, S, E, C, vmem_cap, cores):
    # Use at most ~55% of physical VMEM for the pipelined blocks (headroom for
    # compiler scratch / semaphores).  v5e/v6e (128 MiB) get big blocks; v7x (64 MiB)
    # stays conservative.
    data_budget = int(vmem_cap * 0.55)
    per8 = max(1, _block_vmem_bytes(8, S, E, C))
    tb = max(1, (data_budget * 8) // per8)
    tb = min(tb, B)
    # Only split the batch across grid steps on multi-TensorCore chips (v7x / megacore);
    # on single-TC v5e/v6e a split just adds ~0.35us per-step overhead for no benefit.
    if cores > 1 and B > 1:
        tb = min(tb, pl.cdiv(B, cores))
    if tb >= B:
        return B
    # TB is the second-to-last dim of the 2-D blocks -> must be a multiple of 8
    # unless it spans the whole batch.
    tb = max(8, (tb // 8) * 8)
    return min(tb, B)


# ---------------------------------------------------------------------------
# Public entry point
# ---------------------------------------------------------------------------
def cross_attention_pooling_expert(x, mask_bool, cross_query, key_w, query_w,
                                   block_b=None):
    """x: (B,S,E) f32, mask_bool: (B,S) bool (True = masked),
    cross_query: (B,1,C) f32, key_w: (E,E), query_w: (E,C). Returns (B,E) f32."""
    B, S, E = x.shape
    C = cross_query.shape[-1]

    # One-time algebraic fusion (full precision, per correctness review):
    #   scores = (x @ Wk^T) @ (cq @ Wq^T)^T == (cq @ (Wq^T @ Wk)) @ x^T
    w_eff = jnp.dot(query_w.T, key_w,
                    precision=jax.lax.Precision.HIGHEST)         # (C, E)
    cq2 = cross_query.reshape(B, C)                              # squeeze q dim
    mask_f = mask_bool.astype(jnp.float32)                       # (B, S)

    vmem_cap, cores = _tpu_vmem_and_cores()
    if block_b is None:
        block_b = _choose_block_b(B, S, E, C, vmem_cap, cores)
    grid_b = pl.cdiv(B, block_b)   # padded tail block: rows are independent, tail
                                   # writes past B are dropped by the pipeline.

    vmem_limit = _block_vmem_bytes(block_b, S, E, C) + (2 << 20)
    vmem_limit = int(min(max(vmem_limit, 4 << 20), int(vmem_cap * 0.9)))

    cost = pl.CostEstimate(
        flops=2 * B * E * (C + 2 * S),                # q_eff + scores + pooling
        transcendentals=B * S,                        # exp (plus B reciprocals)
        bytes_accessed=4 * (B * S * E + B * C + B * S + C * E + B * E),
    )

    out = pl.pallas_call(
        _cross_attn_pool_kernel,
        out_shape=jax.ShapeDtypeStruct((B, E), jnp.float32),
        grid_spec=pltpu.PrefetchScalarGridSpec(
            num_scalar_prefetch=0,
            grid=(grid_b,),
            in_specs=[
                pl.BlockSpec((block_b, S, E), lambda b: (b, 0, 0)),   # x
                pl.BlockSpec((block_b, C), lambda b: (b, 0)),         # cross_query
                pl.BlockSpec((block_b, S), lambda b: (b, 0)),         # mask (f32)
                pl.BlockSpec((C, E), lambda b: (0, 0)),               # fused weight
            ],
            out_specs=pl.BlockSpec((block_b, E), lambda b: (b, 0)),
        ),
        compiler_params=pltpu.CompilerParams(
            dimension_semantics=("parallel",),
            vmem_limit_bytes=vmem_limit,
        ),
        cost_estimate=cost,
    )(x, cq2, mask_f, w_eff)
    return out


# ---------------------------------------------------------------------------
# Reference + self-test
# ---------------------------------------------------------------------------
def _xavier_normal(key, shape):
    fan_out, fan_in = shape
    std = (2.0 / (fan_in + fan_out)) ** 0.5
    return std * jax.random.normal(key, shape, dtype=jnp.float32)


def _reference(x, mask_bool, cross_query, key_w, query_w):
    # Unfused pure-JAX mirror of the PyTorch module (validates the W_eff fusion too).
    tq = jnp.einsum("bqc,ec->bqe", cross_query, query_w)          # cq @ Wq^T  (B,1,E)
    keys = jnp.einsum("bse,fe->bsf", x, key_w)                    # x @ Wk^T   (B,S,E)
    scores = jnp.einsum("bsf,bqf->bsq", keys, tq)[..., 0]         # (B,S)
    scores = jnp.where(mask_bool, -jnp.inf, scores)
    allm = jnp.all(mask_bool, axis=1, keepdims=True)
    scores = jnp.where(allm, 1.0, scores)
    w = jax.nn.softmax(scores, axis=-1)
    return jnp.sum(x * w[..., None], axis=1)


if __name__ == "__main__":
    B, S, E, C = 8, 8, 32, 16   # batch, seq, emb_dim, cross_att_dim

    root = jax.random.PRNGKey(0)
    k_x, k_cq, k_kw, k_qw, k_m = jax.random.split(root, 5)

    x = jax.random.normal(k_x, (B, S, E), dtype=jnp.float32)
    cross_query = jax.random.normal(k_cq, (B, 1, C), dtype=jnp.float32)

    # Deterministic mask: mixed rows, one fully-masked row (exercises the
    # all-masked -> uniform-softmax branch), one fully-valid row.
    mask = jax.random.bernoulli(k_m, 0.35, (B, S))
    mask = mask.at[0].set(jnp.array([False, False, True, False, True, True, False, True]))
    mask = mask.at[1].set(True)
    mask = mask.at[2].set(False)

    key_w = _xavier_normal(k_kw, (E, E))    # nn.Linear(emb_dim, emb_dim, bias=False)
    query_w = _xavier_normal(k_qw, (E, C))  # nn.Linear(cross_att_dim, emb_dim, bias=False)

    out = cross_attention_pooling_expert(x, mask, cross_query, key_w, query_w)
    out = jax.block_until_ready(out)

    ref = _reference(x, mask, cross_query, key_w, query_w)
    assert out.shape == (B, E)
    err = jnp.max(jnp.abs(out - ref))
    assert jnp.allclose(out, ref, atol=1e-4, rtol=1e-4), f"mismatch vs reference (max abs err {err})"

    print("KERNEL_OK")
</pallas_src>

<mosaic_0001>
module attributes {stable_mosaic.version = 11 : i64} {
  func.func @_cross_attn_pool_kernel(%arg0: i32, %arg1: memref<8x8x32xf32, #tpu.memory_space<vmem>>, %arg2: memref<8x16xf32, #tpu.memory_space<vmem>>, %arg3: memref<8x8xf32, #tpu.memory_space<vmem>>, %arg4: memref<16x32xf32, #tpu.memory_space<vmem>>, %arg5: memref<8x32xf32, #tpu.memory_space<vmem>>) attributes {dimension_semantics = [#tpu.dimension_semantics<parallel>], iteration_bounds = array<i64: 1>, scalar_prefetch = 0 : i64, scratch_operands = 0 : i64, tpu.core_type = #tpu.core_type<tc>, window_params = [{transform_indices = @transform_0, window_bounds = array<i64: 8, 8, 32>}, {transform_indices = @transform_1, window_bounds = array<i64: 8, 16>}, {transform_indices = @transform_2, window_bounds = array<i64: 8, 8>}, {pipeline_mode = #tpu.pipeline_mode<synchronous>, transform_indices = @transform_3, window_bounds = array<i64: 16, 32>}, {transform_indices = @transform_4, window_bounds = array<i64: 8, 32>}]} {
    %c0 = arith.constant 0 : index
    %c0_0 = arith.constant 0 : index
    %c0_1 = arith.constant 0 : index
    %0 = vector.load %arg1[%c0, %c0_0, %c0_1] : memref<8x8x32xf32, #tpu.memory_space<vmem>>, vector<8x8x32xf32>
    %c0_2 = arith.constant 0 : index
    %c0_3 = arith.constant 0 : index
    %1 = vector.load %arg2[%c0_2, %c0_3] : memref<8x16xf32, #tpu.memory_space<vmem>>, vector<8x16xf32>
    %c0_4 = arith.constant 0 : index
    %c0_5 = arith.constant 0 : index
    %2 = vector.load %arg3[%c0_4, %c0_5] : memref<8x8xf32, #tpu.memory_space<vmem>>, vector<8x8xf32>
    %c0_6 = arith.constant 0 : index
    %c0_7 = arith.constant 0 : index
    %3 = vector.load %arg4[%c0_6, %c0_7] : memref<16x32xf32, #tpu.memory_space<vmem>>, vector<16x32xf32>
    %cst = arith.constant dense<0.000000e+00> : vector<8x32xf32>
    %4 = tpu.matmul %1, %3, %cst {dimension_numbers = #tpu.dot_dimension_numbers<[1], [0], [0], [1], [0, 0, 1, 1], [], []>} : vector<8x16xf32>, vector<16x32xf32>, vector<8x32xf32> -> vector<8x32xf32>
    %5 = vector.shape_cast %4 : vector<8x32xf32> to vector<8x1x32xf32>
    %6 = vector.broadcast %5 : vector<8x1x32xf32> to vector<8x8x32xf32>
    %7 = arith.mulf %6, %0 : vector<8x8x32xf32>
    %cst_8 = arith.constant dense<0.000000e+00> : vector<8x8xf32>
    %8 = vector.multi_reduction <add>, %7, %cst_8 [2] : vector<8x8x32xf32> to vector<8x8xf32>
    %cst_9 = arith.constant 5.000000e-01 : f32
    %9 = vector.broadcast %cst_9 : f32 to vector<8x8xf32>
    %10 = arith.cmpf ogt, %2, %9 : vector<8x8xf32>
    %cst_10 = arith.constant 0xFF800000 : f32
    %11 = vector.broadcast %cst_10 : f32 to vector<8x8xf32>
    %12 = arith.select %10, %11, %8 : vector<8x8xi1>, vector<8x8xf32>
    %cst_11 = arith.constant dense<0x7F800000> : vector<8xf32>
    %13 = vector.multi_reduction <minimumf>, %2, %cst_11 [1] : vector<8x8xf32> to vector<8xf32>
    %14 = vector.shape_cast %13 : vector<8xf32> to vector<8x1xf32>
    %cst_12 = arith.constant 5.000000e-01 : f32
    %15 = vector.broadcast %cst_12 : f32 to vector<8x1xf32>
    %16 = arith.cmpf ogt, %14, %15 : vector<8x1xf32>
    %cst_13 = arith.constant 1.000000e+00 : f32
    %17 = vector.shape_cast %16 : vector<8x1xi1> to vector<8x1xi1>
    %18 = vector.broadcast %17 : vector<8x1xi1> to vector<8x8xi1>
    %19 = vector.broadcast %cst_13 : f32 to vector<8x8xf32>
    %20 = arith.select %18, %19, %12 : vector<8x8xi1>, vector<8x8xf32>
    %cst_14 = arith.constant dense<0xFF800000> : vector<8xf32>
    %21 = vector.multi_reduction <maximumf>, %20, %cst_14 [1] : vector<8x8xf32> to vector<8xf32>
    %22 = vector.shape_cast %21 : vector<8xf32> to vector<8x1xf32>
    %23 = vector.broadcast %22 : vector<8x1xf32> to vector<8x8xf32>
    %24 = arith.subf %20, %23 : vector<8x8xf32>
    %25 = math.exp %24 : vector<8x8xf32>
    %cst_15 = arith.constant dense<0.000000e+00> : vector<8xf32>
    %26 = vector.multi_reduction <add>, %25, %cst_15 [1] : vector<8x8xf32> to vector<8xf32>
    %27 = vector.shape_cast %26 : vector<8xf32> to vector<8x1xf32>
    %28 = tpu.reciprocal %27 {approx = true} : vector<8x1xf32> -> vector<8x1xf32>
    %29 = arith.mulf %27, %28 : vector<8x1xf32>
    %cst_16 = arith.constant 2.000000e+00 : f32
    %30 = vector.broadcast %cst_16 : f32 to vector<8x1xf32>
    %31 = arith.subf %30, %29 : vector<8x1xf32>
    %32 = arith.mulf %28, %31 : vector<8x1xf32>
    %33 = vector.broadcast %32 : vector<8x1xf32> to vector<8x8xf32>
    %34 = arith.mulf %25, %33 : vector<8x8xf32>
    %35 = vector.shape_cast %34 : vector<8x8xf32> to vector<8x8x1xf32>
    %36 = vector.broadcast %35 : vector<8x8x1xf32> to vector<8x8x32xf32>
    %37 = arith.mulf %36, %0 : vector<8x8x32xf32>
    %cst_17 = arith.constant dense<0.000000e+00> : vector<8x32xf32>
    %38 = vector.multi_reduction <add>, %37, %cst_17 [1] : vector<8x8x32xf32> to vector<8x32xf32>
    %c0_18 = arith.constant 0 : index
    %c0_19 = arith.constant 0 : index
    %39 = vector.load %arg5[%c0_18, %c0_19] : memref<8x32xf32, #tpu.memory_space<vmem>>, vector<8x32xf32>
    tpu.vector_store %arg5[%c0_18, %c0_19], %38 {strides = array<i32>} : memref<8x32xf32, #tpu.memory_space<vmem>>, vector<8x32xf32>,
    return
  }
  func.func @transform_0(%arg0: i32) -> (i32, i32, i32) {
    %c0_i32 = arith.constant 0 : i32
    %c0_i32_0 = arith.constant 0 : i32
    %c0_i32_1 = arith.constant 0 : i32
    return %arg0, %c0_i32, %c0_i32_0 : i32, i32, i32
  }
  func.func @transform_1(%arg0: i32) -> (i32, i32) {
    %c0_i32 = arith.constant 0 : i32
    %c0_i32_0 = arith.constant 0 : i32
    return %arg0, %c0_i32 : i32, i32
  }
  func.func @transform_2(%arg0: i32) -> (i32, i32) {
    %c0_i32 = arith.constant 0 : i32
    %c0_i32_0 = arith.constant 0 : i32
    return %arg0, %c0_i32 : i32, i32
  }
  func.func @transform_3(%arg0: i32) -> (i32, i32) {
    %c0_i32 = arith.constant 0 : i32
    %c0_i32_0 = arith.constant 0 : i32
    %c0_i32_1 = arith.constant 0 : i32
    return %c0_i32, %c0_i32_0 : i32, i32
  }
  func.func @transform_4(%arg0: i32) -> (i32, i32) {
    %c0_i32 = arith.constant 0 : i32
    %c0_i32_0 = arith.constant 0 : i32
    return %arg0, %c0_i32 : i32, i32
  }
}

</mosaic_0001>

<bundles_post_ra>
// kernel: tpu_custom_call.1
= control target key start
LH: loop header
LB: loop body
LE: loop exit
PB: predicated region body
PF: predicated region fallthrough
CT: control target
= control target key end

     0   :  { %9 = vsyncpa [#allocation3], 0  ;;  %s867_s0 = inlined_call_operand.hbm [shape: f32[8,8,32], index: 0, kind: input, shape index: {}]   ;;  %s868_s1 = inlined_call_operand.hbm [shape: f32[8,16], index: 1, kind: input, shape index: {}]   ;;  %s869_s2 = inlined_call_operand.hbm [shape: f32[8,8], index: 2, kind: input, shape index: {}]   ;;  %s870_s3 = inlined_call_operand.hbm [shape: f32[16,32], index: 3, kind: input, shape index: {}]   ;;  %s871_s4 = inlined_call_operand.hbm [shape: f32[8,32], index: 4, kind: output, shape index: {}]  }
   0x1   :  { %10 = vsyncpa [#allocation6], 0 }
   0x2   :  { %11 = vsyncpa [#allocation9], 0 }
   0x3   :  { %12 = vsyncpa [#allocation4], 0  ;;  %s660_s15 = smov [#allocation5]   ;;  %s661_s17 = smov [#allocation2]  }
   0x4   :  { %s31_s16 = sshll.u32 %s660_s15, 4  ;;  %s18_s18 = sshll.u32 %s661_s17, 4  ;;  %s32_s16 = int_to_ptr.vmem [resolvable:$true] %s31_s16  ;;  %s696_s18 = int_to_ptr.vmem [resolvable:$true] %s18_s18 }
   0x5   :  { %s542_s21 = scalar_lea.hbm %s868_s1, 128 }
   0x6   :  { %p543_p0 = scmp.ne.s32.totalorder %s868_s1, %s542_s21  ;;  %p546_p1 = scmp.lt.u32.totalorder %s542_s21, %s868_s1 }
   0x8   :  { %p548_p2 = pnand %p546_p1, %p543_p0 }
   0xa   :  { %551 = shalt.err (!%p548_p2)
}
   0xb   :  { %s552_s26 = scalar_lea.vmem %s32_s16, 128  ;;  %p557_p4 = scmp.lt.s32.totalorder %s32_s16, %s32_s16 }
   0xc   :  { %p553_p3 = scmp.ne.s32.totalorder %s32_s16, %s552_s26  ;;  %p558_p5 = scmp.lt.s32.totalorder %s552_s26, %s552_s26 }
   0xe   :  { %p559_p6 = por %p558_p5, %p557_p4 }
  0x10   :  { %p560_p7 = pnand %p559_p6, %p553_p3 }
  0x12   :  { %563 = shalt.err (!%p560_p7)
}
  0x13   :  { %34 = dma.hbm_to_vmem [thread:$0]  %s868_s1, 128, %s32_s16, [#allocation6]  }
  0x14   :  { %s564_s5 = scalar_lea.hbm %s867_s0, 1024 }
  0x15   :  { %p565_p8 = scmp.ne.s32.totalorder %s867_s0, %s564_s5  ;;  %p568_p9 = scmp.lt.u32.totalorder %s564_s5, %s867_s0 }
  0x17   :  { %p570_p10 = pnand %p568_p9, %p565_p8 }
  0x19   :  { %573 = shalt.err (!%p570_p10)
}
  0x1a   :  { %s574_s10 = scalar_lea.vmem %s696_s18, 1024  ;;  %p579_p12 = scmp.lt.s32.totalorder %s696_s18, %s696_s18 }
  0x1b   :  { %p575_p11 = scmp.ne.s32.totalorder %s696_s18, %s574_s10  ;;  %p580_p13 = scmp.lt.s32.totalorder %s574_s10, %s574_s10 }
  0x1d   :  { %p581_p0 = por %p580_p13, %p579_p12 }
  0x1f   :  { %p582_p1 = pnand %p581_p0, %p575_p11 }
  0x21   :  { %585 = shalt.err (!%p582_p1)
}
  0x22   :  { %s662_s1 = smov 128   ;;  %s663_s11 = smov 8  }
  0x23   :  { %24 = dma.hbm_to_vmem [thread:$0]  %s867_s0, 1024, %s696_s18, [#allocation3], %s662_s1, %s662_s1, %s663_s11  }
  0x24   :  { %s664_s14 = smov [#allocation7]   ;;  %s665_s16 = smov [#allocation8]  }
  0x25   :  { %s41_s15 = sshll.u32 %s664_s14, 4  ;;  %s50_s17 = sshll.u32 %s665_s16, 4  ;;  %s42_s15 = int_to_ptr.vmem [resolvable:$true] %s41_s15  ;;  %s730_s17 = int_to_ptr.vmem [resolvable:$true] %s50_s17 }
  0x26   :  { %s586_s21 = scalar_lea.hbm %s869_s2, 128 }
  0x27   :  { %p587_p2 = scmp.ne.s32.totalorder %s869_s2, %s586_s21  ;;  %p590_p3 = scmp.lt.u32.totalorder %s586_s21, %s869_s2 }
  0x29   :  { %p592_p4 = pnand %p590_p3, %p587_p2 }
  0x2b   :  { %595 = shalt.err (!%p592_p4)
}
  0x2c   :  { %s596_s0 = scalar_lea.vmem %s42_s15, 128  ;;  %p601_p6 = scmp.lt.s32.totalorder %s42_s15, %s42_s15 }
  0x2d   :  { %p597_p5 = scmp.ne.s32.totalorder %s42_s15, %s596_s0  ;;  %p602_p7 = scmp.lt.s32.totalorder %s596_s0, %s596_s0 }
  0x2f   :  { %p603_p8 = por %p602_p7, %p601_p6 }
  0x31   :  { %p604_p9 = pnand %p603_p8, %p597_p5 }
  0x33   :  { %607 = shalt.err (!%p604_p9)
}
  0x34   :  { %44 = dma.hbm_to_vmem [thread:$0]  %s869_s2, 128, %s42_s15, [#allocation6]  }
  0x35   :  { %s608_s29 = scalar_lea.hbm %s870_s3, 256 }
  0x36   :  { %p609_p10 = scmp.ne.s32.totalorder %s870_s3, %s608_s29  ;;  %p612_p11 = scmp.lt.u32.totalorder %s608_s29, %s870_s3 }
  0x38   :  { %p614_p12 = pnand %p612_p11, %p609_p10 }
  0x3a   :  { %617 = shalt.err (!%p614_p12)
}
  0x3b   :  { %s618_s8 = scalar_lea.vmem %s730_s17, 256  ;;  %p623_p0 = scmp.lt.s32.totalorder %s730_s17, %s730_s17 }
  0x3c   :  { %p619_p13 = scmp.ne.s32.totalorder %s730_s17, %s618_s8  ;;  %p624_p1 = scmp.lt.s32.totalorder %s618_s8, %s618_s8 }
  0x3e   :  { %p625_p2 = por %p624_p1, %p623_p0 }
  0x40   :  { %p626_p3 = pnand %p625_p2, %p619_p13 }
  0x42   :  { %629 = shalt.err (!%p626_p3)
}
  0x43   :  { %56 = dma.hbm_to_vmem [thread:$0]  %s870_s3, 256, %s730_s17, [#allocation9], %s662_s1, %s662_s1, %s663_s11  }
  0x44   :  { %652 = dma.done.wait [#allocation3], 1024  }
  0x45   :  { %653 = vsyncadd [#allocation3], 4294966272 }
  0x46   :  { %654 = dma.done.wait [#allocation6], 256  }
  0x47   :  { %655 = vsyncadd [#allocation6], 4294967040 }
  0x48   :  { %656 = dma.done.wait [#allocation9], 256  }
  0x49   :  { %657 = vsyncadd [#allocation9], 4294967040  ;;  %v666_v0 = vmov 0.0|0.0   ;;  %vm667_vm0 = vmmov 0   ;;  %v668_v1 = vmov 0.0   ;;  %v79_v2 = vld [vmem:[#allocation8] sm:$0xff]  ;;  %v160_v8 = vlaneseq }
  0x4a   :  { %524 = vmatprep.subr.bf16.mxu0 %v666_v0  ;;  %521 = vmatprep.mubr.msk.f32.mxu0 %vm667_vm0, %v668_v1  ;;  %v80_v3 = vld [vmem:[#allocation8 + $0x8] sm:$0xff]  ;;  %v77_v5 = vld [vmem:[#allocation5] sm:$0xff]  ;;  %vm81_vm1 = vcmask 130048   ;;  %v669_v6 = vmov 1966171168   ;;  %vm253_vm2 = vcmask 261120  }
  0x4b   :  { %v525_v4 = vpack.c.bf16 %v80_v3, %v79_v2  ;;  %v158_v7 = vunpack.c.l.s4 %v669_v6  ;;  %v765_v10 = vshrl.u32 %v160_v8, 7  ;;  %v771_v20 = vld [vmem:[#allocation2] sm:$0xff]  ;;  %v774_v26 = vld [vmem:[#allocation2 + $0x8] sm:$0xff]  ;;  %v777_v28 = vld [vmem:[#allocation2 + $0x10] sm:$0xff]  ;;  %vm337_vm3 = vcmask 64512   ;;  %s670_s3 = smov [#allocation10]  }
  0x4c   :  { %v784_v36 = vld [vmem:[#allocation2 + $0x18] sm:$0xff]  ;;  %v788_v40 = vld [vmem:[#allocation2 + $0x20] sm:$0xff]  ;;  %v795_v47 = vld [vmem:[#allocation2 + $0x28] sm:$0xff]  ;;  %v288_v62 = vand.u32 127, %v160_v8  ;;  %vm321_vm4 = vcmask 1041409   ;;  %vm323_vm5 = vcmask 1042434  }
  0x4d   :  { %526 = vmatpush3.bf16.msra.mxu0 %v525_v4  ;;  %v159_v9 = vunpack.c.0.s8 %v158_v7  ;;  %v769_v16 = vsub.s32 0, %v765_v10  ;;  %v798_v49 = vld [vmem:[#allocation2 + $0x30] sm:$0xff]  ;;  %v805_v55 = vld [vmem:[#allocation2 + $0x38] sm:$0xff]  ;;  %v78_v58 = vld [vmem:[#allocation7] sm:$0xff]  ;;  %vm325_vm6 = vcmask 1043459   ;;  %vm327_vm7 = vcmask 1044484  }
  0x4e   :  { %v338_v60 = vsel %vm337_vm3, %v78_v58, inf  ;;  %v291_v0 = vsub.s32 %v288_v62, %v765_v10  ;;  %vm329_vm8 = vcmask 1045509   ;;  %vm331_vm9 = vcmask 1046534   ;;  %s502_s10 = sshll.u32 %s670_s3, 4  ;;  %s503_s10 = int_to_ptr.vmem [resolvable:$true] %s502_s10 }
  0x4f   :  { %v162_v11 = vsub.s32 %v159_v9, %v765_v10  ;;  %vm333_vm10 = vcmask 1047559   ;;  %vm278_vm11 = vcmp.gt.f32.partialorder %v78_v58, 0.5  ;;  %s630_s1 = scalar_lea.vmem %s503_s10, 128  ;;  %p635_p5 = scmp.lt.s32.totalorder %s503_s10, %s503_s10 }
  0x50   :  { %522 = vmatmul.mubr.msk.f32.vlgmr.msra.gmra.mrb[0].mxu0 %vm81_vm1, %v77_v5  ;;  %p631_p4 = scmp.ne.s32.totalorder %s503_s10, %s630_s1  ;;  %p636_p6 = scmp.lt.s32.totalorder %s630_s1, %s630_s1 }
  0x52   :  { %p637_p7 = por %p636_p6, %p635_p5 }
  0x54   :  { %p638_p8 = pnand %p637_p7, %p631_p4 }
 0x123   :  { %v151_v12 = vpop.f32.mrb[0].mxu0 }
 0x124   :  { %v156_v13 = vcombine.high %v151_v12, %v151_v12  ;;  %v163_v14 = vrot.slane %v151_v12, %v162_v11  ;;  %v523_v15 = vpop.f32.mrb[1].mxu0 }
 0x126   :  { %v170_v17 = vrot.slane %v156_v13, %v162_v11  ;;  %v171_v18 = vcombine.high %v163_v14, %v163_v14  ;;  %v179_v19 = vrot.slane %v163_v14, %v162_v11 }
 0x128   :  { %v172_v21 = vcombine.high %v170_v17, %v170_v17  ;;  %v186_v22 = vrot.slane %v170_v17, %v162_v11  ;;  %v193_v23 = vrot.slane %v171_v18, %v162_v11  ;;  %v208_v24 = vrot.slane %v179_v19, %v769_v16 }
 0x129   :  { %v201_v25 = vcombine.high %v179_v19, %v179_v19 }
 0x12a   :  { %v245_v27 = vmul.f32 %v208_v24, %v771_v20  ;;  %v212_v29 = vrot.slane %v193_v23, %v769_v16  ;;  %v203_v30 = vcombine.high %v193_v23, %v193_v23  ;;  %v224_v32 = vrot.slane %v186_v22, %v769_v16 }
 0x12b   :  { %v216_v31 = vrot.slane %v201_v25, %v769_v16  ;;  %v200_v33 = vrot.slane %v172_v21, %v162_v11  ;;  %v202_v38 = vcombine.high %v186_v22, %v186_v22 }
 0x12c   :  { %v254_v34 = vsel %vm253_vm2, %v245_v27, 0.0  ;;  %v246_v35 = vmul.f32 %v212_v29, %v774_v26  ;;  %v220_v37 = vrot.slane %v203_v30, %v769_v16  ;;  %v249_v46 = vmul.f32 %v224_v32, %v788_v40 }
 0x12d   :  { %255 = vadd.xlane.f32.xlu0 %v254_v34  ;;  %v247_v39 = vmul.f32 %v216_v31, %v777_v28  ;;  %v228_v43 = vrot.slane %v200_v33, %v769_v16  ;;  %v204_v44 = vcombine.high %v200_v33, %v200_v33  ;;  %v232_v48 = vrot.slane %v202_v38, %v769_v16 }
 0x12e   :  { %v248_v42 = vmul.f32 %v220_v37, %v784_v36  ;;  %v257_v45 = vsel %vm253_vm2, %v246_v35, 0.0  ;;  %v266_v53 = vsel %vm253_vm2, %v249_v46, 0.0 }
 0x12f   :  { %v260_v41 = vsel %vm253_vm2, %v247_v39, 0.0  ;;  %v250_v51 = vmul.f32 %v228_v43, %v795_v47  ;;  %v236_v52 = vrot.slane %v204_v44, %v769_v16  ;;  %v251_v54 = vmul.f32 %v232_v48, %v798_v49 }
 0x130   :  { %261 = vadd.xlane.f32.xlu1 %v260_v41  ;;  %v263_v50 = vsel %vm253_vm2, %v248_v42, 0.0  ;;  %v368_v44 = vsub.s32 1, %v765_v10 }
 0x131   :  { %258 = vadd.xlane.f32.xlu0 %v257_v45  ;;  %v269_v56 = vsel %vm253_vm2, %v250_v51, 0.0  ;;  %v252_v57 = vmul.f32 %v236_v52, %v805_v55  ;;  %v272_v59 = vsel %vm253_vm2, %v251_v54, 0.0  ;;  %v375_v51 = vsub.s32 2, %v765_v10 }
 0x132   :  { %v410_v54 = vsub.s32 7, %v765_v10 }
 0x133   :  { %v275_v61 = vsel %vm253_vm2, %v252_v57, 0.0 }
 0x134   :  { %264 = vadd.xlane.f32.xlu1 %v263_v50  ;;  %v396_v50 = vsub.s32 5, %v765_v10 }
 0x135   :  { %267 = vadd.xlane.f32.xlu0 %v266_v53 }
 0x138   :  { %270 = vadd.xlane.f32.xlu1 %v269_v56  ;;  %v382_v56 = vsub.s32 3, %v765_v10 }
 0x139   :  { %273 = vadd.xlane.f32.xlu0 %v272_v59  ;;  %v389_v59 = vsub.s32 4, %v765_v10 }
 0x13c   :  { %276 = vadd.xlane.f32.xlu1 %v275_v61 }
 0x13d   :  { %339 = vmin.xlane.f32.xlu0 %v338_v60  ;;  %v403_v60 = vsub.s32 6, %v765_v10 }
 0x1ba   :  { %v256_v63 = vpop.xlane.xlu0 %255 }
 0x1bb   :  { %v292_v3 = vrot.slane %v256_v63, %v291_v0 }
 0x1bd   :  { %v262_v1 = vpop.xlane.xlu1 %261 }
 0x1be   :  { %v259_v2 = vpop.xlane.xlu0 %258  ;;  %v300_v5 = vrot.slane %v262_v1, %v291_v0 }
 0x1bf   :  { %v296_v4 = vrot.slane %v259_v2, %v291_v0 }
 0x1c1   :  { %v322_v6 = vsel %vm321_vm4, %v296_v4, %v292_v3  ;;  %v265_v7 = vpop.xlane.xlu1 %264 }
 0x1c2   :  { %v304_v9 = vrot.slane %v265_v7, %v291_v0  ;;  %v324_v11 = vsel %vm323_vm5, %v300_v5, %v322_v6  ;;  %v268_v12 = vpop.xlane.xlu0 %267 }
 0x1c3   :  { %v308_v8 = vrot.slane %v268_v12, %v291_v0 }
 0x1c4   :  { %v326_v13 = vsel %vm325_vm6, %v304_v9, %v324_v11 }
 0x1c5   :  { %v328_v14 = vsel %vm327_vm7, %v308_v8, %v326_v13  ;;  %v271_v15 = vpop.xlane.xlu1 %270 }
 0x1c6   :  { %v312_v17 = vrot.slane %v271_v15, %v291_v0  ;;  %v274_v18 = vpop.xlane.xlu0 %273 }
 0x1c7   :  { %v316_v19 = vrot.slane %v274_v18, %v291_v0 }
 0x1c8   :  { %v330_v21 = vsel %vm329_vm8, %v312_v17, %v328_v14 }
 0x1c9   :  { %v332_v22 = vsel %vm331_vm9, %v316_v19, %v330_v21  ;;  %v277_v23 = vpop.xlane.xlu1 %276 }
 0x1ca   :  { %v320_v24 = vrot.slane %v277_v23, %v291_v0  ;;  %v340_v25 = vpop.xlane.xlu0 %339 }
 0x1cb   :  { %vm341_vm12 = vcmp.gt.f32.partialorder %v340_v25, 0.5 }
 0x1cc   :  { %v334_v27 = vsel %vm333_vm10, %v320_v24, %v332_v22 }
 0x1cd   :  { %v336_v29 = vsel %vm278_vm11, -inf, %v334_v27 }
 0x1ce   :  { %v344_v30 = vsel %vm341_vm12, 1.0, %v336_v29 }
 0x1cf   :  { %v345_v31 = vsel %vm337_vm3, %v344_v30, -inf }
 0x1d0   :  { %346 = vmax.xlane.f32.xlu1 %v345_v31 }
 0x25d   :  { %v347_v32 = vpop.xlane.xlu1 %346 }
 0x25e   :  { %v348_v33 = vsub.f32 %v344_v30, %v347_v32 }
 0x260   :  { %v349_v34 = vmul.f32 1.442695, %v348_v33 }
 0x262   :  { %538 = vpow2.f32 %v349_v34 }
 0x26c   :  { %v539_v35 = vpop.eup %538 }
 0x26d   :  { %v351_v37 = vsel %vm337_vm3, %v539_v35, 0.0 }
 0x26e   :  { %352 = vadd.xlane.f32.xlu0 %v351_v37 }
 0x2fb   :  { %v353_v38 = vpop.xlane.xlu0 %352 }
 0x2fc   :  { %540 = vrcp.f32 %v353_v38 }
 0x306   :  { %v541_v39 = vpop.eup %540 }
 0x307   :  { %v355_v41 = vmul.f32 %v541_v39, %v353_v38 }
 0x309   :  { %v356_v42 = vsub.f32 2.0, %v355_v41 }
 0x30b   :  { %v357_v43 = vmul.f32 %v541_v39, %v356_v42 }
 0x30d   :  { %v358_v45 = vmul.f32 %v539_v35, %v357_v43 }
 0x30f   :  { %v369_v46 = vrot.slane %v358_v45, %v368_v44  ;;  %v362_v48 = vrot.slane %v358_v45, %v769_v16  ;;  %v397_v52 = vrot.slane %v358_v45, %v396_v50  ;;  %v376_v53 = vrot.slane %v358_v45, %v375_v51 }
 0x310   :  { %v411_v57 = vrot.slane %v358_v45, %v410_v54  ;;  %v383_v58 = vrot.slane %v358_v45, %v382_v56  ;;  %v390_v16 = vrot.slane %v358_v45, %v389_v59  ;;  %v404_v61 = vrot.slane %v358_v45, %v403_v60 }
 0x311   :  { %371 = vbcast.lane.b32.xlu0 %v369_v46, 256  ;;  %364 = vbcast.lane.b32.xlu1 %v362_v48, 256 }
 0x315   :  { %399 = vbcast.lane.b32.xlu0 %v397_v52, 256  ;;  %378 = vbcast.lane.b32.xlu1 %v376_v53, 256 }
 0x319   :  { %413 = vbcast.lane.b32.xlu0 %v411_v57, 256  ;;  %385 = vbcast.lane.b32.xlu1 %v383_v58, 256 }
 0x31d   :  { %392 = vbcast.lane.b32.xlu1 %v390_v16, 256 }
 0x321   :  { %406 = vbcast.lane.b32.xlu1 %v404_v61, 256 }
 0x383   :  { %v372_v62 = vpop.permute.xlu0 %371  ;;  %v365_v63 = vpop.permute.xlu1 %364 }
 0x384   :  { %v416_v0 = vmul.f32 %v372_v62, %v774_v26  ;;  %v415_v1 = vmul.f32 %v365_v63, %v771_v20 }
 0x386   :  { %v430_v2 = vsel %vm253_vm2, %v416_v0, 0.0  ;;  %v423_v3 = vsel %vm253_vm2, %v415_v1, 0.0 }
 0x387   :  { %v431_v4 = vrot.slane %v430_v2, 4  ;;  %v424_v5 = vrot.slane %v423_v3, 4  ;;  %v400_v6 = vpop.permute.xlu0 %399  ;;  %v379_v7 = vpop.permute.xlu1 %378 }
 0x388   :  { %v420_v9 = vmul.f32 %v400_v6, %v795_v47  ;;  %v417_v10 = vmul.f32 %v379_v7, %v777_v28 }
 0x389   :  { %v432_v11 = vadd.f32 %v431_v4, %v430_v2  ;;  %v425_v12 = vadd.f32 %v424_v5, %v423_v3 }
 0x38a   :  { %v458_v8 = vsel %vm253_vm2, %v420_v9, 0.0  ;;  %v437_v26 = vsel %vm253_vm2, %v417_v10, 0.0 }
 0x38b   :  { %v433_v13 = vrot.slane %v432_v11, 2  ;;  %v426_v20 = vrot.slane %v425_v12, 2  ;;  %v438_v14 = vrot.slane %v437_v26, 4  ;;  %v414_v15 = vpop.permute.xlu0 %413  ;;  %v386_v17 = vpop.permute.xlu1 %385  ;;  %v459_v18 = vrot.slane %v458_v8, 4 }
 0x38c   :  { %v422_v19 = vmul.f32 %v414_v15, %v805_v55  ;;  %v418_v21 = vmul.f32 %v386_v17, %v784_v36 }
 0x38d   :  { %v439_v22 = vadd.f32 %v438_v14, %v437_v26  ;;  %v434_v23 = vadd.f32 %v433_v13, %v432_v11  ;;  %v427_v24 = vadd.f32 %v426_v20, %v425_v12  ;;  %v460_v29 = vadd.f32 %v459_v18, %v458_v8 }
 0x38e   :  { %v472_v47 = vsel %vm253_vm2, %v422_v19, 0.0  ;;  %v444_v28 = vsel %vm253_vm2, %v418_v21, 0.0 }
 0x38f   :  { %v440_v25 = vrot.slane %v439_v22, 2  ;;  %v393_v27 = vpop.permute.xlu1 %392  ;;  %v473_v30 = vrot.slane %v472_v47, 4  ;;  %v445_v31 = vrot.slane %v444_v28, 4  ;;  %v435_v36 = vrot.slane %v434_v23, 1 }
 0x390   :  { %v419_v32 = vmul.f32 %v393_v27, %v788_v40  ;;  %v428_v39 = vrot.slane %v427_v24, 1  ;;  %v461_v41 = vrot.slane %v460_v29, 2 }
 0x391   :  { %v441_v33 = vadd.f32 %v440_v25, %v439_v22  ;;  %v474_v34 = vadd.f32 %v473_v30, %v472_v47  ;;  %v446_v35 = vadd.f32 %v445_v31, %v444_v28  ;;  %v436_v52 = vadd.f32 %v435_v36, %v434_v23 }
 0x392   :  { %v451_v55 = vsel %vm253_vm2, %v419_v32, 0.0  ;;  %v429_v53 = vadd.f32 %v428_v39, %v427_v24  ;;  %v462_v54 = vadd.f32 %v461_v41, %v460_v29 }
 0x393   :  { %v452_v37 = vrot.slane %v451_v55, 4  ;;  %v407_v38 = vpop.permute.xlu1 %406  ;;  %v447_v42 = vrot.slane %v446_v35, 2  ;;  %v442_v44 = vrot.slane %v441_v33, 1  ;;  %v475_v46 = vrot.slane %v474_v34, 2 }
 0x394   :  { %v421_v43 = vmul.f32 %v407_v38, %v798_v49  ;;  %v487_v49 = vsel %vm321_vm4, %v436_v52, %v429_v53  ;;  %v463_v63 = vrot.slane %v462_v54, 1 }
 0x395   :  { %v453_v45 = vadd.f32 %v452_v37, %v451_v55  ;;  %v448_v48 = vadd.f32 %v447_v42, %v446_v35  ;;  %v443_v57 = vadd.f32 %v442_v44, %v441_v33  ;;  %v476_v16 = vadd.f32 %v475_v46, %v474_v34 }
 0x396   :  { %v465_v50 = vsel %vm253_vm2, %v421_v43, 0.0  ;;  %v464_v7 = vadd.f32 %v463_v63, %v462_v54 }
 0x397   :  { %v454_v40 = vrot.slane %v453_v45, 2  ;;  %v466_v51 = vrot.slane %v465_v50, 4  ;;  %v449_v56 = vrot.slane %v448_v48, 1  ;;  %v488_v0 = vsel %vm323_vm5, %v443_v57, %v487_v49 }
 0x398   :  { %v477_v3 = vrot.slane %v476_v16, 1 }
 0x399   :  { %v455_v58 = vadd.f32 %v454_v40, %v453_v45  ;;  %v467_v59 = vadd.f32 %v466_v51, %v465_v50  ;;  %v450_v60 = vadd.f32 %v449_v56, %v448_v48 }
 0x39a   :  { %v478_v10 = vadd.f32 %v477_v3, %v476_v16 }
 0x39b   :  { %v456_v61 = vrot.slane %v455_v58, 1  ;;  %v468_v62 = vrot.slane %v467_v59, 2  ;;  %v489_v4 = vsel %vm325_vm6, %v450_v60, %v488_v0 }
 0x39d   :  { %v457_v1 = vadd.f32 %v456_v61, %v455_v58  ;;  %v469_v2 = vadd.f32 %v468_v62, %v467_v59 }
 0x39f   :  { %v470_v5 = vrot.slane %v469_v2, 1  ;;  %v490_v6 = vsel %vm327_vm7, %v457_v1, %v489_v4 }
 0x3a0   :  { %v491_v11 = vsel %vm329_vm8, %v464_v7, %v490_v6 }
 0x3a1   :  { %v471_v9 = vadd.f32 %v470_v5, %v469_v2 }
 0x3a3   :  { %v492_v12 = vsel %vm331_vm9, %v471_v9, %v491_v11 }
 0x3a4   :  { %v493_v8 = vsel %vm333_vm10, %v478_v10, %v492_v12 }
 0x3a5   :  { %495 = vst.msk [vmem:[#allocation10] sm:$0xff] %vm253_vm2, %v493_v8 }
 0x3a6   :  { %641 = shalt.err (!%p638_p8)
}
 0x3a7   :  { %s642_s13 = scalar_lea.hbm %s871_s4, 128 }
 0x3a8   :  { %p643_p9 = scmp.ne.s32.totalorder %s871_s4, %s642_s13  ;;  %p646_p10 = scmp.lt.u32.totalorder %s642_s13, %s871_s4 }
 0x3aa   :  { %p648_p11 = pnand %p646_p10, %p643_p9 }
 0x3ac   :  { %651 = shalt.err (!%p648_p11)
}
 0x3ad   :  { %505 = dma.vmem_to_hbm [thread:$0]  %s503_s10, 128, %s871_s4, [#allocation4]  }
 0x3ae   :  { %658 = dma.done.wait [#allocation4], 128  }
 0x3af   :  { %659 = vsyncadd [#allocation4], 4294967168 }
 0x3b0   :  { %509 = vsyncpa [#allocation3], 1 }
 0x3b1   :  { %510 = vsyncpa [#allocation6], 1 }
 0x3b2   :  { %511 = vsyncpa [#allocation9], 1 }
 0x3b3   :  { %512 = vsyncpa [#allocation4], 1 }

</bundles_post_ra>
